<compile_context>
chip_gen: v6e
topology: v6e:2x2x1
jax: 0.10.0
libtpu: 0.0.40
codegen_flags: <defaults>
</compile_context>

<pallas_src>
import functools

import jax
import jax.numpy as jnp
import numpy as np
from jax.experimental import pallas as pl
from jax.experimental.pallas import tpu as pltpu


# ---------------------------------------------------------------------------
# Fused Pallas kernel: ReLU -> conv-transpose GEMM -> BatchNorm (train mode)
# ---------------------------------------------------------------------------
def _fused_upconv_bn_kernel(a_ref, b_ref, gb_ref, o_ref, *, c_out, eps):
    # a_ref  : (M, 9*C_in)        bf16  3x3-tap patches, rows = (n, jh, jw)
    # b_ref  : (9*C_in, 4*C_out)  bf16  parity-blocked conv-transpose weights
    # gb_ref : (2, C_out)         f32   row 0 = gamma, row 1 = beta
    # o_ref  : (M, 4*C_out)       f32   column index = (rh*2 + rw)*C_out + co
    a = jnp.maximum(a_ref[...], 0)                        # fused ReLU (exact in bf16)
    y = jnp.dot(a, b_ref[...],
                preferred_element_type=jnp.float32)       # single MXU pass, f32 acc

    m = y.shape[0]
    cnt = jnp.float32(m * 4)                              # N*(2H)*(2W) samples/channel
    s = jnp.sum(y, axis=0, keepdims=True)                 # (1, 4*C_out)
    sq = jnp.sum(y * y, axis=0, keepdims=True)            # (1, 4*C_out)
    # combine the 4 output-parity groups of each channel (lane slices, no reshape)
    s_c = (s[:, 0:c_out] + s[:, c_out:2 * c_out]
           + s[:, 2 * c_out:3 * c_out] + s[:, 3 * c_out:4 * c_out])
    sq_c = (sq[:, 0:c_out] + sq[:, c_out:2 * c_out]
            + sq[:, 2 * c_out:3 * c_out] + sq[:, 3 * c_out:4 * c_out])
    mean = s_c / cnt
    var = sq_c / cnt - mean * mean                        # biased var (train-mode BN)
    inv = jax.lax.rsqrt(var + eps)                        # EUP rsqrt
    gamma = gb_ref[0:1, :]
    beta = gb_ref[1:2, :]
    scale = gamma * inv                                   # (1, C_out)
    shift = beta - mean * scale                           # (1, C_out)
    scale4 = jnp.concatenate([scale, scale, scale, scale], axis=1)   # (1, 4*C_out)
    shift4 = jnp.concatenate([shift, shift, shift, shift], axis=1)
    o_ref[...] = y * scale4 + shift4                      # lane-dense (128) store


# ---------------------------------------------------------------------------
# Wrapper-side (tiny) data plumbing
# ---------------------------------------------------------------------------
def _build_patches(x):
    # (N, C_in, H, W) -> (N*H*W, 9*C_in) bf16 ; rows=(n,jh,jw), cols=(th,tw,ci)
    N, C_in, H, W = x.shape
    xp = jnp.pad(x, ((0, 0), (0, 0), (1, 1), (1, 1))).transpose(0, 2, 3, 1)
    taps = [xp[:, th:th + H, tw:tw + W, :] for th in range(3) for tw in range(3)]
    a = jnp.stack(taps, axis=3)                           # (N, H, W, 9, C_in)
    return a.reshape(N * H * W, 9 * C_in).astype(jnp.bfloat16)


def _build_parity_weight(wconv):
    # (C_in, C_out, 4, 4) -> (9*C_in, 4*C_out) bf16 ; rows=(th,tw,ci), cols=(rh,rw,co)
    C_in, C_out = wconv.shape[0], wconv.shape[1]
    b = jnp.zeros((3, 3, C_in, 2, 2, C_out), jnp.float32)
    for rh in range(2):
        for rw in range(2):
            for dh in range(2):
                for dw in range(2):
                    b = b.at[rh + dh, rw + dw, :, rh, rw, :].set(
                        wconv[:, :, 3 - rh - 2 * dh, 3 - rw - 2 * dw])
    return b.reshape(9 * C_in, 4 * C_out).astype(jnp.bfloat16)


@functools.partial(jax.jit, static_argnames=("eps",))
def upconv_unit_forward(x, wconv, bias, gamma, beta, eps=1e-5):
    del bias  # ConvTranspose2d bias is exactly cancelled by train-mode BatchNorm
    N, C_in, H, W = x.shape
    C_out = wconv.shape[1]
    M = N * H * W

    a = _build_patches(x)                                 # (M, 9*C_in)        bf16
    b = _build_parity_weight(wconv)                       # (9*C_in, 4*C_out)  bf16
    gb = jnp.stack([gamma.astype(jnp.float32),
                    beta.astype(jnp.float32)], axis=0)    # (2, C_out)         f32

    kernel = functools.partial(_fused_upconv_bn_kernel, c_out=C_out, eps=eps)
    y = pl.pallas_call(
        kernel,
        out_shape=jax.ShapeDtypeStruct((M, 4 * C_out), jnp.float32),
        grid_spec=pltpu.PrefetchScalarGridSpec(
            num_scalar_prefetch=0,
            grid=(1,),                                    # whole problem resident in VMEM
            in_specs=[
                pl.BlockSpec((M, 9 * C_in), lambda i: (0, 0)),
                pl.BlockSpec((9 * C_in, 4 * C_out), lambda i: (0, 0)),
                pl.BlockSpec((2, C_out), lambda i: (0, 0)),
            ],
            out_specs=pl.BlockSpec((M, 4 * C_out), lambda i: (0, 0)),
        ),
        compiler_params=pltpu.CompilerParams(
            dimension_semantics=("arbitrary",)),
    )(a, b, gb)

    # parity columns -> NCHW (N, C_out, 2H, 2W); single cheap XLA transpose
    y6 = y.reshape(N, H, W, 2, 2, C_out)                  # (n, jh, jw, rh, rw, co)
    return y6.transpose(0, 5, 1, 3, 2, 4).reshape(N, C_out, 2 * H, 2 * W)
    # TODO(synk): BatchNorm2d running_mean/running_var buffer updates (training
    # side effect with track_running_stats=True) are not modeled; they do not
    # affect the forward output.


# ---------------------------------------------------------------------------
# Pure-JAX f32 reference (for verification)
# ---------------------------------------------------------------------------
def reference_forward(x, wconv, bias, gamma, beta, eps=1e-5):
    xr = jnp.maximum(x, 0.0)
    # conv_transpose(k=4, s=2, p=1) == dilated conv with flipped kernel, pad k-1-p=2
    w_flip = jnp.flip(wconv, axis=(2, 3)).transpose(1, 0, 2, 3)   # (C_out, C_in, 4, 4)
    y = jax.lax.conv_general_dilated(
        xr, w_flip, window_strides=(1, 1),
        padding=[(2, 2), (2, 2)], lhs_dilation=(2, 2),
        dimension_numbers=('NCHW', 'OIHW', 'NCHW'),
        precision=jax.lax.Precision.HIGHEST)
    y = y + bias.reshape(1, -1, 1, 1)
    mean = y.mean(axis=(0, 2, 3), keepdims=True)
    var = y.var(axis=(0, 2, 3), keepdims=True)
    return ((y - mean) * jax.lax.rsqrt(var + eps)
            * gamma.reshape(1, -1, 1, 1) + beta.reshape(1, -1, 1, 1))


if __name__ == "__main__":
    # UpConvUnit(in_channels=4, out_channels=32): conv input channels = 4*2 = 8
    in_channels, out_channels = 4, 32
    C_in = in_channels * 2
    N, H, W = 2, 16, 16

    key = jax.random.PRNGKey(0)
    kx, kw, kb = jax.random.split(key, 3)
    x = jax.random.normal(kx, (N, C_in, H, W), dtype=jnp.float32)

    # ConvTranspose2d weight: (C_in, C_out, KH, KW); BN: gamma=1, beta=0 defaults
    bound = 1.0 / np.sqrt(C_in * 4 * 4)
    wconv = jax.random.uniform(kw, (C_in, out_channels, 4, 4),
                               minval=-bound, maxval=bound, dtype=jnp.float32)
    bias = jax.random.uniform(kb, (out_channels,),
                              minval=-bound, maxval=bound, dtype=jnp.float32)
    gamma = jnp.ones((out_channels,), jnp.float32)
    beta = jnp.zeros((out_channels,), jnp.float32)

    out = upconv_unit_forward(x, wconv, bias, gamma, beta)
    out = jax.block_until_ready(out)

    ref = reference_forward(x, wconv, bias, gamma, beta)
    assert out.shape == (N, out_channels, 2 * H, 2 * W)
    # bf16 MXU operands vs f32 HIGHEST-precision reference -> ~1e-2 agreement
    np.testing.assert_allclose(np.asarray(out), np.asarray(ref), rtol=2e-2, atol=2e-2)

    print("KERNEL_OK")
</pallas_src>

<mosaic_0001>
module attributes {stable_mosaic.version = 11 : i64} {
  func.func @_fused_upconv_bn_kernel(%arg0: i32, %arg1: memref<512x72xbf16, #tpu.memory_space<vmem>>, %arg2: memref<72x128xbf16, #tpu.memory_space<vmem>>, %arg3: memref<2x32xf32, #tpu.memory_space<vmem>>, %arg4: memref<512x128xf32, #tpu.memory_space<vmem>>) attributes {dimension_semantics = [#tpu.dimension_semantics<arbitrary>], iteration_bounds = array<i64: 1>, scalar_prefetch = 0 : i64, scratch_operands = 0 : i64, tpu.core_type = #tpu.core_type<tc>, window_params = [{pipeline_mode = #tpu.pipeline_mode<synchronous>, transform_indices = @transform_0, window_bounds = array<i64: 512, 72>}, {pipeline_mode = #tpu.pipeline_mode<synchronous>, transform_indices = @transform_1, window_bounds = array<i64: 72, 128>}, {pipeline_mode = #tpu.pipeline_mode<synchronous>, transform_indices = @transform_2, window_bounds = array<i64: 2, 32>}, {pipeline_mode = #tpu.pipeline_mode<synchronous>, transform_indices = @transform_3, window_bounds = array<i64: 512, 128>}]} {
    %c0 = arith.constant 0 : index
    %c0_0 = arith.constant 0 : index
    %0 = vector.load %arg1[%c0, %c0_0] : memref<512x72xbf16, #tpu.memory_space<vmem>>, vector<512x72xbf16>
    %cst = arith.constant 0.000000e+00 : bf16
    %1 = vector.broadcast %cst : bf16 to vector<512x72xbf16>
    %2 = arith.maximumf %0, %1 : vector<512x72xbf16>
    %c0_1 = arith.constant 0 : index
    %c0_2 = arith.constant 0 : index
    %3 = vector.load %arg2[%c0_1, %c0_2] : memref<72x128xbf16, #tpu.memory_space<vmem>>, vector<72x128xbf16>
    %cst_3 = arith.constant dense<0.000000e+00> : vector<512x128xf32>
    %4 = tpu.matmul %2, %3, %cst_3 {dimension_numbers = #tpu.dot_dimension_numbers<[1], [0], [0], [1], [0, 0, 1, 1], [], []>} : vector<512x72xbf16>, vector<72x128xbf16>, vector<512x128xf32> -> vector<512x128xf32>
    %cst_4 = arith.constant dense<0.000000e+00> : vector<128xf32>
    %5 = vector.multi_reduction <add>, %4, %cst_4 [0] : vector<512x128xf32> to vector<128xf32>
    %6 = vector.shape_cast %5 : vector<128xf32> to vector<1x128xf32>
    %7 = arith.mulf %4, %4 : vector<512x128xf32>
    %cst_5 = arith.constant dense<0.000000e+00> : vector<128xf32>
    %8 = vector.multi_reduction <add>, %7, %cst_5 [0] : vector<512x128xf32> to vector<128xf32>
    %9 = vector.shape_cast %8 : vector<128xf32> to vector<1x128xf32>
    %10 = vector.extract_strided_slice %6 {offsets = [0, 0], sizes = [1, 32], strides = [1, 1]} : vector<1x128xf32> to vector<1x32xf32>
    %11 = vector.extract_strided_slice %6 {offsets = [0, 32], sizes = [1, 32], strides = [1, 1]} : vector<1x128xf32> to vector<1x32xf32>
    %12 = arith.addf %10, %11 : vector<1x32xf32>
    %13 = vector.extract_strided_slice %6 {offsets = [0, 64], sizes = [1, 32], strides = [1, 1]} : vector<1x128xf32> to vector<1x32xf32>
    %14 = arith.addf %12, %13 : vector<1x32xf32>
    %15 = vector.extract_strided_slice %6 {offsets = [0, 96], sizes = [1, 32], strides = [1, 1]} : vector<1x128xf32> to vector<1x32xf32>
    %16 = arith.addf %14, %15 : vector<1x32xf32>
    %17 = vector.extract_strided_slice %9 {offsets = [0, 0], sizes = [1, 32], strides = [1, 1]} : vector<1x128xf32> to vector<1x32xf32>
    %18 = vector.extract_strided_slice %9 {offsets = [0, 32], sizes = [1, 32], strides = [1, 1]} : vector<1x128xf32> to vector<1x32xf32>
    %19 = arith.addf %17, %18 : vector<1x32xf32>
    %20 = vector.extract_strided_slice %9 {offsets = [0, 64], sizes = [1, 32], strides = [1, 1]} : vector<1x128xf32> to vector<1x32xf32>
    %21 = arith.addf %19, %20 : vector<1x32xf32>
    %22 = vector.extract_strided_slice %9 {offsets = [0, 96], sizes = [1, 32], strides = [1, 1]} : vector<1x128xf32> to vector<1x32xf32>
    %23 = arith.addf %21, %22 : vector<1x32xf32>
    %cst_6 = arith.constant 2.048000e+03 : f32
    %24 = vector.broadcast %cst_6 : f32 to vector<1x32xf32>
    %25 = arith.divf %16, %24 : vector<1x32xf32>
    %cst_7 = arith.constant 2.048000e+03 : f32
    %26 = vector.broadcast %cst_7 : f32 to vector<1x32xf32>
    %27 = arith.divf %23, %26 : vector<1x32xf32>
    %28 = arith.mulf %25, %25 : vector<1x32xf32>
    %29 = arith.subf %27, %28 : vector<1x32xf32>
    %cst_8 = arith.constant 9.99999974E-6 : f32
    %30 = vector.broadcast %cst_8 : f32 to vector<1x32xf32>
    %31 = arith.addf %29, %30 : vector<1x32xf32>
    %32 = math.rsqrt %31 : vector<1x32xf32>
    %c0_9 = arith.constant 0 : index
    %c0_10 = arith.constant 0 : index
    %33 = vector.load %arg3[%c0_9, %c0_10] : memref<2x32xf32, #tpu.memory_space<vmem>>, vector<1x32xf32>
    %c1 = arith.constant 1 : index
    %c0_11 = arith.constant 0 : index
    %34 = vector.load %arg3[%c1, %c0_11] : memref<2x32xf32, #tpu.memory_space<vmem>>, vector<1x32xf32>
    %35 = arith.mulf %33, %32 : vector<1x32xf32>
    %36 = arith.mulf %25, %35 : vector<1x32xf32>
    %37 = arith.subf %34, %36 : vector<1x32xf32>
    %38 = tpu.concatenate %35, %35, %35, %35 in 1 : vector<1x32xf32>, vector<1x32xf32>, vector<1x32xf32>, vector<1x32xf32> -> vector<1x128xf32>
    %39 = tpu.concatenate %37, %37, %37, %37 in 1 : vector<1x32xf32>, vector<1x32xf32>, vector<1x32xf32>, vector<1x32xf32> -> vector<1x128xf32>
    %40 = vector.broadcast %38 : vector<1x128xf32> to vector<512x128xf32>
    %41 = arith.mulf %4, %40 : vector<512x128xf32>
    %42 = vector.broadcast %39 : vector<1x128xf32> to vector<512x128xf32>
    %43 = arith.addf %41, %42 : vector<512x128xf32>
    %c0_12 = arith.constant 0 : index
    %c0_13 = arith.constant 0 : index
    %44 = vector.load %arg4[%c0_12, %c0_13] : memref<512x128xf32, #tpu.memory_space<vmem>>, vector<512x128xf32>
    tpu.vector_store %arg4[%c0_12, %c0_13], %43 {strides = array<i32>} : memref<512x128xf32, #tpu.memory_space<vmem>>, vector<512x128xf32>,
    return
  }
  func.func @transform_0(%arg0: i32) -> (i32, i32) {
    %c0_i32 = arith.constant 0 : i32
    %c0_i32_0 = arith.constant 0 : i32
    %c0_i32_1 = arith.constant 0 : i32
    return %c0_i32, %c0_i32_0 : i32, i32
  }
  func.func @transform_1(%arg0: i32) -> (i32, i32) {
    %c0_i32 = arith.constant 0 : i32
    %c0_i32_0 = arith.constant 0 : i32
    %c0_i32_1 = arith.constant 0 : i32
    return %c0_i32, %c0_i32_0 : i32, i32
  }
  func.func @transform_2(%arg0: i32) -> (i32, i32) {
    %c0_i32 = arith.constant 0 : i32
    %c0_i32_0 = arith.constant 0 : i32
    %c0_i32_1 = arith.constant 0 : i32
    return %c0_i32, %c0_i32_0 : i32, i32
  }
  func.func @transform_3(%arg0: i32) -> (i32, i32) {
    %c0_i32 = arith.constant 0 : i32
    %c0_i32_0 = arith.constant 0 : i32
    %c0_i32_1 = arith.constant 0 : i32
    return %c0_i32, %c0_i32_0 : i32, i32
  }
}

</mosaic_0001>

<bundles_post_ra>
// kernel: upconv_unit_forward.1
= control target key start
LH: loop header
LB: loop body
LE: loop exit
PB: predicated region body
PF: predicated region fallthrough
CT: control target
= control target key end

     0   :  { %vm436_vm0 = vcmask 1043456   ;;  %v1405_v6 = vmov 0   ;;  %vm339_vm1 = vcmask 588800   ;;  %s1407_s10 = smov 96   ;;  %s1408_s11 = smov 64   ;;  %vm979_vm2 = vcmask 261120   ;;  %s2681_s1 = inlined_call_operand.vmem [shape: bf16[72,128], index: 1, kind: input, shape index: {}]   ;;  %s2682_s0 = inlined_call_operand.vmem [shape: bf16[512,72], index: 0, kind: input, shape index: {}]   ;;  %s2683_s2 = inlined_call_operand.vmem [shape: f32[2,32], index: 2, kind: input, shape index: {}]   ;;  %s2684_s3 = inlined_call_operand.vmem [shape: f32[512,128], index: 3, kind: output, shape index: {}]  }
   0x1   :  { %v1398_v0 = vld [vmem:[%s2681_s1 + $0x20] ss:$0 sps:$4 sm:$0xff]   ;;  %v1399_v1 = vld [vmem:[%s2681_s1 + $0x18] sm:$0xff]   ;;  %v1400_v3 = vld [vmem:[%s2681_s1 + $0x10] sm:$0xff]   ;;  %vm981_vm3 = vcmask 523264   ;;  %vm983_vm4 = vcmask 785408  }
   0x2   :  { %1392 = vmatprep.subr.msk.bf16.mxu0 %vm436_vm0, %v1398_v0  ;;  %v438_v2 = vsel %vm436_vm0, %v1398_v0, 0  ;;  %1393 = vmatprep.subr.msk.bf16.mxu1 %vm436_vm0, %v1398_v0  ;;  %v15_v4 = vld [vmem:[%s2682_s0] sm:$0xf]  ;;  %v16_v5 = vld [vmem:[%s2682_s0 + $0x4] sm:$0xf]  ;;  %v1401_v9 = vld [vmem:[%s2681_s1 + $0x8] sm:$0xff]  }
   0x3   :  { %1309 = vmatpush3.bf16.msra.mxu0 %v438_v2  ;;  %1387 = vmatpush3.bf16.msra.mxu1 %v438_v2  ;;  %v79_v7 = vmax.bf16 %v1405_v6, %v15_v4  ;;  %v80_v8 = vmax.bf16 %v1405_v6, %v16_v5  ;;  %v17_v11 = vld [vmem:[%s2682_s0 + $0x8] sm:$0xf]  ;;  %v18_v12 = vld [vmem:[%s2682_s0 + $0xc] sm:$0xf]  ;;  %v1402_v13 = vld [vmem:[%s2681_s1] sm:$0xff]  }
   0x4   :  { %1310 = vmatprep.subr.bf16.mxu0 %v1399_v1  ;;  %1383 = vmatprep.subr.bf16.mxu1 %v1399_v1  ;;  %v19_v14 = vld [vmem:[%s2682_s0 + $0x10] sm:$0xf]  ;;  %v20_v15 = vld [vmem:[%s2682_s0 + $0x14] sm:$0xf]  ;;  %v81_v16 = vmax.bf16 %v1405_v6, %v17_v11  ;;  %v82_v17 = vmax.bf16 %v1405_v6, %v18_v12  ;;  %v45_v18 = vld [vmem:[%s2682_s0 + $0x78] sm:$0xf] }
   0x5   :  { %v1202_v10 = vcombine.low %v79_v7, %v80_v8  ;;  %v83_v19 = vmax.bf16 %v1405_v6, %v19_v14  ;;  %v84_v20 = vmax.bf16 %v1405_v6, %v20_v15  ;;  %v46_v21 = vld [vmem:[%s2682_s0 + $0x7c] sm:$0xf]  ;;  %v47_v22 = vld [vmem:[%s2682_s0 + $0x80] sm:$0xf]  ;;  %v48_v23 = vld [vmem:[%s2682_s0 + $0x84] sm:$0xf]  ;;  %v1482_v24 = vmax.bf16 %v1405_v6, %v45_v18 }
   0x6   :  { %v49_v25 = vld [vmem:[%s2682_s0 + $0x88] sm:$0xf]  ;;  %v50_v26 = vld [vmem:[%s2682_s0 + $0x8c] sm:$0xf]  ;;  %v51_v27 = vld [vmem:[%s2682_s0 + $0x90] sm:$0xf]  ;;  %v1494_v28 = vmax.bf16 %v1405_v6, %v46_v21  ;;  %v111_v29 = vmax.bf16 %v1405_v6, %v47_v22  ;;  %v1203_v31 = vcombine.low %v81_v16, %v82_v17  ;;  %v112_v32 = vmax.bf16 %v1405_v6, %v48_v23 }
   0x7   :  { %1311 = vmatpush3.bf16.msra.mxu0 %v1399_v1  ;;  %1388 = vmatpush3.bf16.msra.mxu1 %v1399_v1  ;;  %v52_v30 = vld [vmem:[%s2682_s0 + $0x94] sm:$0xf]  ;;  %v113_v33 = vmax.bf16 %v1405_v6, %v49_v25  ;;  %v114_v34 = vmax.bf16 %v1405_v6, %v50_v26  ;;  %v1204_v35 = vcombine.low %v83_v19, %v84_v20  ;;  %v21_v36 = vld [vmem:[%s2682_s0 + $0x18] sm:$0xf]  ;;  %v22_v37 = vld [vmem:[%s2682_s0 + $0x1c] sm:$0xf] }
   0x8   :  { %1312 = vmatprep.subr.bf16.mxu0 %v1400_v3  ;;  %1384 = vmatprep.subr.bf16.mxu1 %v1400_v3  ;;  %v1217_v38 = vcombine.low %v1482_v24, %v1494_v28  ;;  %v115_v39 = vmax.bf16 %v1405_v6, %v51_v27  ;;  %v116_v40 = vmax.bf16 %v1405_v6, %v52_v30  ;;  %v23_v41 = vld [vmem:[%s2682_s0 + $0x20] sm:$0xf]  ;;  %v24_v42 = vld [vmem:[%s2682_s0 + $0x24] sm:$0xf]  ;;  %v53_v46 = vld [vmem:[%s2682_s0 + $0x98] sm:$0xf] }
   0x9   :  { %1318 = vmatprep.mubr.msk.bf16.mxu0 %vm339_vm1, %v1202_v10  ;;  %v1218_v43 = vcombine.low %v111_v29, %v112_v32  ;;  %v1219_v44 = vcombine.low %v113_v33, %v114_v34  ;;  %v54_v47 = vld [vmem:[%s2682_s0 + $0x9c] sm:$0xf]  ;;  %v85_v48 = vmax.bf16 %v1405_v6, %v21_v36  ;;  %v86_v49 = vmax.bf16 %v1405_v6, %v22_v37  ;;  %v55_v50 = vld [vmem:[%s2682_s0 + $0xa0] sm:$0xf]  ;;  %v56_v51 = vld [vmem:[%s2682_s0 + $0xa4] sm:$0xf] }
   0xa   :  { %v1220_v45 = vcombine.low %v115_v39, %v116_v40  ;;  %v87_v52 = vmax.bf16 %v1405_v6, %v23_v41  ;;  %v88_v53 = vmax.bf16 %v1405_v6, %v24_v42  ;;  %v117_v54 = vmax.bf16 %v1405_v6, %v53_v46  ;;  %v77_v59 = vld [vmem:[%s2682_s0 + $0xf8] sm:$0xf]  ;;  %v78_v60 = vld [vmem:[%s2682_s0 + $0xfc] sm:$0xf]  ;;  %v25_v62 = vld [vmem:[%s2682_s0 + $0x28] sm:$0xf] }
   0xb   :  { %1313 = vmatpush3.bf16.msra.mxu0 %v1400_v3  ;;  %1389 = vmatpush3.bf16.msra.mxu1 %v1400_v3  ;;  %v118_v55 = vmax.bf16 %v1405_v6, %v54_v47  ;;  %v119_v56 = vmax.bf16 %v1405_v6, %v55_v50  ;;  %v120_v57 = vmax.bf16 %v1405_v6, %v56_v51  ;;  %v26_v63 = vld [vmem:[%s2682_s0 + $0x2c] sm:$0xf]  ;;  %v27_v0 = vld [vmem:[%s2682_s0 + $0x30] sm:$0xf]  ;;  %v28_v1 = vld [vmem:[%s2682_s0 + $0x34] sm:$0xf] }
   0xc   :  { %1314 = vmatprep.subr.bf16.mxu0 %v1401_v9  ;;  %1385 = vmatprep.subr.bf16.mxu1 %v1401_v9  ;;  %v1205_v58 = vcombine.low %v85_v48, %v86_v49  ;;  %v1206_v61 = vcombine.low %v87_v52, %v88_v53  ;;  %v57_v4 = vld [vmem:[%s2682_s0 + $0xa8] sm:$0xf]  ;;  %v58_v5 = vld [vmem:[%s2682_s0 + $0xac] sm:$0xf]  ;;  %v1569_v7 = vmax.bf16 %v1405_v6, %v77_v59  ;;  %v59_v11 = vld [vmem:[%s2682_s0 + $0xb0] sm:$0xf] }
   0xd   :  { %1350 = vmatprep.mubr.msk.bf16.mxu1 %vm339_vm1, %v1218_v43  ;;  %v1221_v2 = vcombine.low %v117_v54, %v118_v55  ;;  %v1222_v3 = vcombine.low %v119_v56, %v120_v57  ;;  %v1572_v8 = vmax.bf16 %v1405_v6, %v78_v60  ;;  %v90_v10 = vmax.bf16 %v1405_v6, %v26_v63  ;;  %v60_v12 = vld [vmem:[%s2682_s0 + $0xb4] sm:$0xf]  ;;  %v29_v22 = vld [vmem:[%s2682_s0 + $0x38] sm:$0xf]  ;;  %v30_v23 = vld [vmem:[%s2682_s0 + $0x3c] sm:$0xf] }
   0xe   :  { %v92_v14 = vmax.bf16 %v1405_v6, %v28_v1  ;;  %v121_v16 = vmax.bf16 %v1405_v6, %v57_v4  ;;  %v122_v17 = vmax.bf16 %v1405_v6, %v58_v5  ;;  %v123_v18 = vmax.bf16 %v1405_v6, %v59_v11  ;;  %v31_v25 = vld [vmem:[%s2682_s0 + $0x40] sm:$0xf]  ;;  %v32_v26 = vld [vmem:[%s2682_s0 + $0x44] sm:$0xf]  ;;  %v61_v30 = vld [vmem:[%s2682_s0 + $0xb8] sm:$0xf] }
   0xf   :  { %1315 = vmatpush3.bf16.msra.mxu0 %v1401_v9  ;;  %1390 = vmatpush3.bf16.msra.mxu1 %v1401_v9  ;;  %v89_v9 = vmax.bf16 %v1405_v6, %v25_v62  ;;  %v1233_v15 = vcombine.low %v1569_v7, %v1572_v8  ;;  %v124_v19 = vmax.bf16 %v1405_v6, %v60_v12  ;;  %v63_v34 = vld [vmem:[%s2682_s0 + $0xc0] sm:$0xf]  ;;  %v34_v46 = vld [vmem:[%s2682_s0 + $0x4c] sm:$0xf]  ;;  %v35_v47 = vld [vmem:[%s2682_s0 + $0x50] sm:$0xf] }
  0x10   :  { %1316 = vmatprep.subr.bf16.mxu0 %v1402_v13  ;;  %1386 = vmatprep.subr.bf16.mxu1 %v1402_v13  ;;  %v1223_v27 = vcombine.low %v121_v16, %v122_v17  ;;  %v93_v32 = vmax.bf16 %v1405_v6, %v29_v22  ;;  %v94_v33 = vmax.bf16 %v1405_v6, %v30_v23  ;;  %v36_v48 = vld [vmem:[%s2682_s0 + $0x54] sm:$0xf]  ;;  %v65_v51 = vld [vmem:[%s2682_s0 + $0xc8] sm:$0xf]  ;;  %v66_v52 = vld [vmem:[%s2682_s0 + $0xcc] sm:$0xf] }
  0x11   :  { %v1207_v20 = vcombine.low %v89_v9, %v90_v10  ;;  %v1224_v29 = vcombine.low %v123_v18, %v124_v19  ;;  %v95_v36 = vmax.bf16 %v1405_v6, %v31_v25  ;;  %v96_v37 = vmax.bf16 %v1405_v6, %v32_v26  ;;  %v67_v55 = vld [vmem:[%s2682_s0 + $0xd0] sm:$0xf]  ;;  %v68_v56 = vld [vmem:[%s2682_s0 + $0xd4] sm:$0xf]  ;;  %v37_v1 = vld [vmem:[%s2682_s0 + $0x58] sm:$0xf] }
  0x12   :  { %v125_v39 = vmax.bf16 %v1405_v6, %v61_v30  ;;  %v127_v41 = vmax.bf16 %v1405_v6, %v63_v34  ;;  %v1209_v43 = vcombine.low %v93_v32, %v94_v33  ;;  %v98_v54 = vmax.bf16 %v1405_v6, %v34_v46  ;;  %v40_v4 = vld [vmem:[%s2682_s0 + $0x64] sm:$0xf]  ;;  %v69_v10 = vld [vmem:[%s2682_s0 + $0xd8] sm:$0xf]  ;;  %v70_v11 = vld [vmem:[%s2682_s0 + $0xdc] sm:$0xf] }
  0x13   :  { %1317 = vmatpush3.bf16.msra.mxu0 %v1402_v13  ;;  %1391 = vmatpush3.bf16.msra.mxu1 %v1402_v13  ;;  %v91_v13 = vmax.bf16 %v1405_v6, %v27_v0  ;;  %v99_v57 = vmax.bf16 %v1405_v6, %v35_v47  ;;  %v129_v59 = vmax.bf16 %v1405_v6, %v65_v51  ;;  %v72_v16 = vld [vmem:[%s2682_s0 + $0xe4] sm:$0xf]  ;;  %v41_v26 = vld [vmem:[%s2682_s0 + $0x68] sm:$0xf]  ;;  %v44_v30 = vld [vmem:[%s2682_s0 + $0x74] sm:$0xf] }
  0x14   :  { %v130_v60 = vmax.bf16 %v1405_v6, %v66_v52  ;;  %v132_v62 = vmax.bf16 %v1405_v6, %v68_v56  ;;  %v101_v12 = vmax.bf16 %v1405_v6, %v37_v1  ;;  %v104_v18 = vmax.bf16 %v1405_v6, %v40_v4  ;;  %v73_v33 = vld [vmem:[%s2682_s0 + $0xe8] sm:$0xf]  ;;  %v74_v34 = vld [vmem:[%s2682_s0 + $0xec] sm:$0xf] }
  0x15   :  { %v1208_v21 = vcombine.low %v91_v13, %v92_v14  ;;  %v71_v14 = vld [vmem:[%s2682_s0 + $0xe0] sm:$0xf]  ;;  %v133_v19 = vmax.bf16 %v1405_v6, %v69_v10  ;;  %v136_v22 = vmax.bf16 %v1405_v6, %v72_v16 }
  0x16   :  { %1319 = vmatmul.mubr.msk.bf16.vlgmr.msra.gmra.mxu0 %vm339_vm1, %v1203_v31  ;;  %1351 = vmatmul.mubr.msk.bf16.vlgmr.msra.gmra.mxu1 %vm339_vm1, %v1219_v44  ;;  %v62_v31 = vld [vmem:[%s2682_s0 + $0xbc] sm:$0xf]  ;;  %v1210_v44 = vcombine.low %v95_v36, %v96_v37  ;;  %v1227_v5 = vcombine.low %v129_v59, %v130_v60  ;;  %v75_v37 = vld [vmem:[%s2682_s0 + $0xf0] sm:$0xf] }
  0x17   :  { %1322 = vmatprep.mubr.msk.bf16.mxu0 %vm339_vm1, %v1204_v35  ;;  %1354 = vmatprep.mubr.msk.bf16.mxu1 %vm339_vm1, %v1220_v45  ;;  %v64_v35 = vld [vmem:[%s2682_s0 + $0xc4] sm:$0xf]  ;;  %v126_v40 = vmax.bf16 %v1405_v6, %v62_v31  ;;  %v33_v45 = vld [vmem:[%s2682_s0 + $0x48] sm:$0xf] }
  0x18   :  { %v128_v42 = vmax.bf16 %v1405_v6, %v64_v35  ;;  %v97_v53 = vmax.bf16 %v1405_v6, %v33_v45  ;;  %v105_v35 = vmax.bf16 %v1405_v6, %v41_v26 }
  0x19   :  { %v1225_v49 = vcombine.low %v125_v39, %v126_v40  ;;  %v76_v39 = vld [vmem:[%s2682_s0 + $0xf4] sm:$0xf] }
  0x1a   :  { %v1226_v50 = vcombine.low %v127_v41, %v128_v42  ;;  %v1211_v63 = vcombine.low %v97_v53, %v98_v54  ;;  %v108_v41 = vmax.bf16 %v1405_v6, %v44_v30  ;;  %v137_v42 = vmax.bf16 %v1405_v6, %v73_v33 }
  0x1b   :  { %v140_v45 = vmax.bf16 %v1405_v6, %v76_v39 }
  0x1e   :  { %1323 = vmatmul.mubr.msk.bf16.gmra.mxu0 %vm339_vm1, %v1205_v58  ;;  %1355 = vmatmul.mubr.msk.bf16.gmra.mxu1 %vm339_vm1, %v1221_v2  ;;  %v100_v58 = vmax.bf16 %v1405_v6, %v36_v48  ;;  %v38_v2 = vld [vmem:[%s2682_s0 + $0x5c] sm:$0xf] }
  0x1f   :  { %1326 = vmatprep.mubr.msk.bf16.mxu0 %vm339_vm1, %v1206_v61  ;;  %1358 = vmatprep.mubr.msk.bf16.mxu1 %vm339_vm1, %v1222_v3  ;;  %v131_v61 = vmax.bf16 %v1405_v6, %v67_v55  ;;  %v39_v3 = vld [vmem:[%s2682_s0 + $0x60] sm:$0xf]  ;;  %v102_v13 = vmax.bf16 %v1405_v6, %v38_v2 }
  0x20   :  { %v1212_v0 = vcombine.low %v99_v57, %v100_v58  ;;  %v103_v17 = vmax.bf16 %v1405_v6, %v39_v3 }
  0x21   :  { %v1228_v9 = vcombine.low %v131_v61, %v132_v62  ;;  %v1213_v23 = vcombine.low %v101_v12, %v102_v13 }
  0x22   :  { %v1214_v25 = vcombine.low %v103_v17, %v104_v18 }
  0x26   :  { %1327 = vmatmul.mubr.msk.bf16.gmra.mxu0 %vm339_vm1, %v1207_v20  ;;  %1359 = vmatmul.mubr.msk.bf16.gmra.mxu1 %vm339_vm1, %v1223_v27  ;;  %v134_v20 = vmax.bf16 %v1405_v6, %v70_v11  ;;  %v42_v27 = vld [vmem:[%s2682_s0 + $0x6c] sm:$0xf] }
  0x27   :  { %1330 = vmatprep.mubr.msk.bf16.mxu0 %vm339_vm1, %v1208_v21  ;;  %1362 = vmatprep.mubr.msk.bf16.mxu1 %vm339_vm1, %v1224_v29  ;;  %v135_v21 = vmax.bf16 %v1405_v6, %v71_v14  ;;  %v43_v29 = vld [vmem:[%s2682_s0 + $0x70] sm:$0xf]  ;;  %v106_v36 = vmax.bf16 %v1405_v6, %v42_v27  ;;  %s1406_s0 = smov 32  }
  0x28   :  { %v1229_v31 = vcombine.low %v133_v19, %v134_v20  ;;  %v107_v40 = vmax.bf16 %v1405_v6, %v43_v29 }
  0x29   :  { %v1230_v32 = vcombine.low %v135_v21, %v136_v22  ;;  %v1215_v46 = vcombine.low %v105_v35, %v106_v36 }
  0x2a   :  { %v1216_v47 = vcombine.low %v107_v40, %v108_v41 }
  0x2e   :  { %1331 = vmatmul.mubr.msk.bf16.gmra.mxu0 %vm339_vm1, %v1209_v43  ;;  %1363 = vmatmul.mubr.msk.bf16.gmra.mxu1 %vm339_vm1, %v1225_v49  ;;  %v138_v43 = vmax.bf16 %v1405_v6, %v74_v34 }
  0x2f   :  { %1334 = vmatprep.mubr.msk.bf16.mxu0 %vm339_vm1, %v1210_v44  ;;  %1366 = vmatprep.mubr.msk.bf16.mxu1 %vm339_vm1, %v1226_v50  ;;  %v139_v44 = vmax.bf16 %v1405_v6, %v75_v37 }
  0x30   :  { %v1231_v48 = vcombine.low %v137_v42, %v138_v43 }
  0x31   :  { %v1232_v49 = vcombine.low %v139_v44, %v140_v45 }
  0x36   :  { %1335 = vmatmul.mubr.msk.bf16.gmra.mxu0 %vm339_vm1, %v1211_v63  ;;  %1367 = vmatmul.mubr.msk.bf16.gmra.mxu1 %vm339_vm1, %v1227_v5 }
  0x37   :  { %1338 = vmatprep.mubr.msk.bf16.mxu0 %vm339_vm1, %v1212_v0  ;;  %1370 = vmatprep.mubr.msk.bf16.mxu1 %vm339_vm1, %v1228_v9 }
  0x3e   :  { %1339 = vmatmul.mubr.msk.bf16.gmra.mxu0 %vm339_vm1, %v1213_v23  ;;  %1371 = vmatmul.mubr.msk.bf16.gmra.mxu1 %vm339_vm1, %v1229_v31 }
  0x3f   :  { %1342 = vmatprep.mubr.msk.bf16.mxu0 %vm339_vm1, %v1214_v25  ;;  %1374 = vmatprep.mubr.msk.bf16.mxu1 %vm339_vm1, %v1230_v32 }
  0x46   :  { %1343 = vmatmul.mubr.msk.bf16.gmra.mxu0 %vm339_vm1, %v1215_v46  ;;  %1375 = vmatmul.mubr.msk.bf16.gmra.mxu1 %vm339_vm1, %v1231_v48 }
  0x47   :  { %1346 = vmatprep.mubr.msk.bf16.mxu0 %vm339_vm1, %v1216_v47  ;;  %1378 = vmatprep.mubr.msk.bf16.mxu1 %vm339_vm1, %v1232_v49 }
  0x4e   :  { %1347 = vmatmul.mubr.msk.bf16.gmra.mxu0 %vm339_vm1, %v1217_v38  ;;  %1379 = vmatmul.mubr.msk.bf16.gmra.mxu1 %vm339_vm1, %v1233_v15 }
  0xd6   :  { %v1750_v6 = vpop.f32.mrf.mxu0  ;;  %v1754_v51 = vpop.f32.mrf.mxu1 }
  0xd7   :  { %v800_v15 = vmul.f32 %v1750_v6, %v1750_v6 }
  0xd8   :  { %v1752_v50 = vpop.f32.mrf.mxu0  ;;  %v1758_v53 = vpop.f32.mrf.mxu1 }
  0xd9   :  { %2707 = vst [vmem:[#allocation2_spill] sm:$0xff] %v1758_v53  ;;  %v798_v24 = vmul.f32 %v1752_v50, %v1752_v50 }
  0xda   :  { %v1756_v52 = vpop.f32.mrf.mxu0  ;;  %v1770_v8 = vpop.f32.mrf.mxu1 }
  0xdb   :  { %v801_v58 = vmul.f32 %v1756_v52, %v1756_v52 }
  0xdc   :  { %v1760_v54 = vpop.f32.mrf.mxu0  ;;  %v1782_v62 = vpop.f32.mrf.mxu1 }
  0xdd   :  { %v729_v28 = vadd.f32 %v1760_v54, %v1752_v50  ;;  %v799_v38 = vmul.f32 %v1760_v54, %v1760_v54  ;;  %2708 = vst [vmem:[#allocation3_spill] sm:$0xff] %v1782_v62 }
  0xde   :  { %v1768_v7 = vpop.f32.mrf.mxu0  ;;  %v1794_v10 = vpop.f32.mrf.mxu1 }
  0xdf   :  { %v730_v55 = vadd.f32 %v1750_v6, %v729_v28  ;;  %v862_v56 = vadd.f32 %v799_v38, %v798_v24  ;;  %v804_v11 = vmul.f32 %v1768_v7, %v1768_v7 }
  0xe0   :  { %v1775_v57 = vpop.f32.mrf.mxu0  ;;  %v1806_v20 = vpop.f32.mrf.mxu1 }
  0xe1   :  { %v863_v59 = vadd.f32 %v862_v56, %v800_v15  ;;  %v731_v60 = vadd.f32 %v1756_v52, %v730_v55  ;;  %v802_v0 = vmul.f32 %v1775_v57, %v1775_v57  ;;  %2709 = vst [vmem:[#allocation4_spill] sm:$0xff] %v1806_v20 }
  0xe2   :  { %v1780_v61 = vpop.f32.mrf.mxu0  ;;  %v1818_v31 = vpop.f32.mrf.mxu1 }
  0xe3   :  { %v732_v63 = vadd.f32 %v731_v60, %v1775_v57  ;;  %v864_v1 = vadd.f32 %v863_v59, %v801_v58  ;;  %v805_v16 = vmul.f32 %v1780_v61, %v1780_v61 }
  0xe4   :  { %v1787_v2 = vpop.f32.mrf.mxu0  ;;  %v1830_v41 = vpop.f32.mrf.mxu1 }
  0xe5   :  { %v865_v3 = vadd.f32 %v864_v1, %v802_v0  ;;  %v733_v4 = vadd.f32 %v732_v63, %v1787_v2  ;;  %v803_v5 = vmul.f32 %v1787_v2, %v1787_v2  ;;  %2710 = vst [vmem:[#allocation5_spill] sm:$0xff] %v1830_v41 }
  0xe6   :  { %v1792_v9 = vpop.f32.mrf.mxu0  ;;  %v1842_v24 = vpop.f32.mrf.mxu1 }
  0xe7   :  { %v734_v12 = vadd.f32 %v1768_v7, %v733_v4  ;;  %v866_v13 = vadd.f32 %v865_v3, %v803_v5  ;;  %v808_v32 = vmul.f32 %v1792_v9, %v1792_v9 }
  0xe8   :  { %v1799_v14 = vpop.f32.mrf.mxu0  ;;  %v1854_v63 = vpop.f32.mrf.mxu1 }
  0xe9   :  { %v867_v17 = vadd.f32 %v866_v13, %v804_v11  ;;  %v735_v18 = vadd.f32 %v1780_v61, %v734_v12  ;;  %v806_v22 = vmul.f32 %v1799_v14, %v1799_v14  ;;  %2711 = vst [vmem:[#allocation6_spill] sm:$0xff] %v1854_v63 }
  0xea   :  { %v1804_v19 = vpop.f32.mrf.mxu0 }
  0xeb   :  { %v736_v21 = vadd.f32 %v735_v18, %v1799_v14  ;;  %v868_v23 = vadd.f32 %v867_v17, %v805_v16  ;;  %v809_v36 = vmul.f32 %v1804_v19, %v1804_v19  ;;  %v1866_v16 = vpop.f32.mrf.mxu1 }
  0xec   :  { %v1811_v25 = vpop.f32.mrf.mxu0 }
  0xed   :  { %v869_v26 = vadd.f32 %v868_v23, %v806_v22  ;;  %v737_v27 = vadd.f32 %v736_v21, %v1811_v25  ;;  %v807_v29 = vmul.f32 %v1811_v25, %v1811_v25 }
  0xee   :  { %v1816_v30 = vpop.f32.mrf.mxu0 }
  0xef   :  { %v738_v33 = vadd.f32 %v1792_v9, %v737_v27  ;;  %v870_v34 = vadd.f32 %v869_v26, %v807_v29  ;;  %v812_v28 = vmul.f32 %v1816_v30, %v1816_v30 }
  0xf0   :  { %v1823_v35 = vpop.f32.mrf.mxu0 }
  0xf1   :  { %v871_v37 = vadd.f32 %v870_v34, %v808_v32  ;;  %v739_v39 = vadd.f32 %v1804_v19, %v738_v33  ;;  %v810_v43 = vmul.f32 %v1823_v35, %v1823_v35  ;;  %v1878_v32 = vpop.f32.mrf.mxu1 }
  0xf2   :  { %v1828_v40 = vpop.f32.mrf.mxu0  ;;  %2712 = vst [vmem:[#allocation7_spill] sm:$0xff] %v1878_v32 }
  0xf3   :  { %v740_v42 = vadd.f32 %v739_v39, %v1823_v35  ;;  %v872_v44 = vadd.f32 %v871_v37, %v809_v36  ;;  %v813_v56 = vmul.f32 %v1828_v40, %v1828_v40 }
  0xf4   :  { %v1835_v45 = vpop.f32.mrf.mxu0 }
  0xf5   :  { %v873_v46 = vadd.f32 %v872_v44, %v810_v43  ;;  %v741_v47 = vadd.f32 %v740_v42, %v1835_v45  ;;  %v811_v48 = vmul.f32 %v1835_v45, %v1835_v45 }
  0xf6   :  { %v1840_v49 = vpop.f32.mrf.mxu0 }
  0xf7   :  { %v742_v38 = vadd.f32 %v1816_v30, %v741_v47  ;;  %v874_v15 = vadd.f32 %v873_v46, %v811_v48  ;;  %v816_v17 = vmul.f32 %v1840_v49, %v1840_v49  ;;  %v1890_v46 = vpop.f32.mrf.mxu1 }
  0xf8   :  { %v1847_v55 = vpop.f32.mrf.mxu0 }
  0xf9   :  { %v875_v58 = vadd.f32 %v874_v15, %v812_v28  ;;  %v743_v59 = vadd.f32 %v1828_v40, %v742_v38  ;;  %v814_v1 = vmul.f32 %v1847_v55, %v1847_v55 }
  0xfa   :  { %v1852_v60 = vpop.f32.mrf.mxu0 }
  0xfb   :  { %v744_v0 = vadd.f32 %v743_v59, %v1847_v55  ;;  %v876_v3 = vadd.f32 %v875_v58, %v813_v56  ;;  %v817_v23 = vmul.f32 %v1852_v60, %v1852_v60 }
  0xfc   :  { %v1859_v4 = vpop.f32.mrf.mxu0 }
  0xfd   :  { %v877_v5 = vadd.f32 %v876_v3, %v814_v1  ;;  %v745_v11 = vadd.f32 %v744_v0, %v1859_v4  ;;  %v815_v12 = vmul.f32 %v1859_v4, %v1859_v4  ;;  %v1902_v0 = vpop.f32.mrf.mxu1 }
  0xfe   :  { %v1864_v13 = vpop.f32.mrf.mxu0  ;;  %2713 = vst [vmem:[#allocation8_spill] sm:$0xff] %v1902_v0 }
  0xff   :  { %v746_v18 = vadd.f32 %v1840_v49, %v745_v11  ;;  %v878_v21 = vadd.f32 %v877_v5, %v815_v12  ;;  %v820_v47 = vmul.f32 %v1864_v13, %v1864_v13 }
 0x100   :  { %v1871_v22 = vpop.f32.mrf.mxu0 }
 0x101   :  { %v879_v26 = vadd.f32 %v878_v21, %v816_v17  ;;  %v747_v27 = vadd.f32 %v1852_v60, %v746_v18  ;;  %v818_v34 = vmul.f32 %v1871_v22, %v1871_v22 }
 0x102   :  { %v1876_v29 = vpop.f32.mrf.mxu0 }
 0x103   :  { %v748_v33 = vadd.f32 %v747_v27, %v1871_v22  ;;  %v880_v36 = vadd.f32 %v879_v26, %v817_v23  ;;  %v821_v15 = vmul.f32 %v1876_v29, %v1876_v29  ;;  %v1914_v23 = vpop.f32.mrf.mxu1 }
 0x104   :  { %v1883_v37 = vpop.f32.mrf.mxu0 }
 0x105   :  { %v881_v39 = vadd.f32 %v880_v36, %v818_v34  ;;  %v749_v42 = vadd.f32 %v748_v33, %v1883_v37  ;;  %v819_v43 = vmul.f32 %v1883_v37, %v1883_v37 }
 0x106   :  { %v1888_v44 = vpop.f32.mrf.mxu0 }
 0x107   :  { %v750_v48 = vadd.f32 %v1864_v13, %v749_v42  ;;  %v882_v28 = vadd.f32 %v881_v39, %v819_v43  ;;  %v824_v26 = vmul.f32 %v1888_v44, %v1888_v44 }
 0x108   :  { %v1895_v38 = vpop.f32.mrf.mxu0 }
 0x109   :  { %v883_v56 = vadd.f32 %v882_v28, %v820_v47  ;;  %v751_v58 = vadd.f32 %v1876_v29, %v750_v48  ;;  %v822_v3 = vmul.f32 %v1895_v38, %v1895_v38  ;;  %v1926_v47 = vpop.f32.mrf.mxu1 }
 0x10a   :  { %v1900_v59 = vpop.f32.mrf.mxu0  ;;  %2714 = vst [vmem:[#allocation9_spill] sm:$0xff] %v1926_v47 }
 0x10b   :  { %v752_v1 = vadd.f32 %v751_v58, %v1895_v38  ;;  %v884_v5 = vadd.f32 %v883_v56, %v821_v15  ;;  %v825_v36 = vmul.f32 %v1900_v59, %v1900_v59 }
 0x10c   :  { %v1907_v11 = vpop.f32.mrf.mxu0 }
 0x10d   :  { %v885_v12 = vadd.f32 %v884_v5, %v822_v3  ;;  %v753_v17 = vadd.f32 %v752_v1, %v1907_v11  ;;  %v823_v18 = vmul.f32 %v1907_v11, %v1907_v11  ;;  %v1936_v5 = vpop.f32.mrf.mxu1 }
 0x10e   :  { %v1912_v21 = vpop.f32.mrf.mxu0 }
 0x10f   :  { %v754_v27 = vadd.f32 %v1888_v44, %v753_v17  ;;  %v886_v33 = vadd.f32 %v885_v12, %v823_v18  ;;  %v828_v12 = vmul.f32 %v1912_v21, %v1912_v21 }
 0x110   :  { %v1919_v34 = vpop.f32.mrf.mxu0 }
 0x111   :  { %v887_v39 = vadd.f32 %v886_v33, %v824_v26  ;;  %v755_v42 = vadd.f32 %v1900_v59, %v754_v27  ;;  %v826_v28 = vmul.f32 %v1919_v34, %v1919_v34 }
 0x112   :  { %v1924_v43 = vpop.f32.mrf.mxu0 }
 0x113   :  { %v756_v48 = vadd.f32 %v755_v42, %v1919_v34  ;;  %v888_v15 = vadd.f32 %v887_v39, %v825_v36  ;;  %v829_v26 = vmul.f32 %v1924_v43, %v1924_v43  ;;  %v1944_v36 = vpop.f32.mrf.mxu1  ;;  %v830_v39 = vmul.f32 %v1758_v53, %v1758_v53 }
 0x114   :  { %v1931_v56 = vpop.f32.mrf.mxu0  ;;  %2715 = vst [vmem:[#allocation10_spill] sm:$0xff] %v1944_v36 }
 0x115   :  { %v889_v58 = vadd.f32 %v888_v15, %v826_v28  ;;  %v757_v1 = vadd.f32 %v756_v48, %v1931_v56  ;;  %v827_v3 = vmul.f32 %v1931_v56, %v1931_v56  ;;  %v831_v15 = vmul.f32 %v1782_v62, %v1782_v62 }
 0x117   :  { %v758_v17 = vadd.f32 %v1912_v21, %v757_v1  ;;  %v890_v18 = vadd.f32 %v889_v58, %v827_v3  ;;  %v1952_v1 = vpop.f32.mrf.mxu1  ;;  %v832_v3 = vmul.f32 %v1754_v51, %v1754_v51 }
 0x118   :  { %2716 = vst [vmem:[#allocation11_spill] sm:$0xff] %v1952_v1 }
 0x119   :  { %v759_v27 = vadd.f32 %v1924_v43, %v758_v17  ;;  %v891_v33 = vadd.f32 %v890_v18, %v828_v12  ;;  %v833_v18 = vmul.f32 %v1770_v8, %v1770_v8 }
 0x11b   :  { %v892_v42 = vadd.f32 %v891_v33, %v829_v26  ;;  %v760_v48 = vadd.f32 %v759_v27, %v1758_v53  ;;  %v1960_v33 = vpop.f32.mrf.mxu1 }
 0x11c   :  { %2717 = vst [vmem:[#allocation12_spill] sm:$0xff] %v1960_v33 }
 0x11d   :  { %v761_v28 = vadd.f32 %v760_v48, %v1782_v62  ;;  %v893_v58 = vadd.f32 %v892_v42, %v830_v39  ;;  %v834_v39 = vmul.f32 %v1806_v20, %v1806_v20 }
 0x11f   :  { %v762_v12 = vadd.f32 %v1754_v51, %v761_v28  ;;  %v894_v17 = vadd.f32 %v893_v58, %v831_v15  ;;  %v835_v28 = vmul.f32 %v1830_v41, %v1830_v41  ;;  %v1968_v15 = vpop.f32.mrf.mxu1  ;;  %v836_v58 = vmul.f32 %v1794_v10, %v1794_v10 }
 0x120   :  { %2718 = vst [vmem:[#allocation13_spill] sm:$0xff] %v1968_v15 }
 0x121   :  { %v895_v26 = vadd.f32 %v894_v17, %v832_v3  ;;  %v763_v27 = vadd.f32 %v1770_v8, %v762_v12  ;;  %v837_v17 = vmul.f32 %v1818_v31, %v1818_v31 }
 0x123   :  { %v764_v48 = vadd.f32 %v763_v27, %v1806_v20  ;;  %v896_v42 = vadd.f32 %v895_v26, %v833_v18  ;;  %v1976_v26 = vpop.f32.mrf.mxu1 }
 0x124   :  { %2719 = vst [vmem:[#allocation14_spill] sm:$0xff] %v1976_v26 }
 0x125   :  { %v897_v62 = vadd.f32 %v896_v42, %v834_v39  ;;  %v765_v53 = vadd.f32 %v764_v48, %v1830_v41  ;;  %v838_v39 = vmul.f32 %v1854_v63, %v1854_v63 }
 0x127   :  { %v766_v3 = vadd.f32 %v1794_v10, %v765_v53  ;;  %v898_v12 = vadd.f32 %v897_v62, %v835_v28  ;;  %v839_v53 = vmul.f32 %v1878_v32, %v1878_v32  ;;  %v1984_v62 = vpop.f32.mrf.mxu1  ;;  %v840_v28 = vmul.f32 %v1842_v24, %v1842_v24 }
 0x128   :  { %2720 = vst [vmem:[#allocation15_spill] sm:$0xff] %v1984_v62 }
 0x129   :  { %v899_v27 = vadd.f32 %v898_v12, %v836_v58  ;;  %v767_v18 = vadd.f32 %v1818_v31, %v766_v3  ;;  %v841_v12 = vmul.f32 %v1866_v16, %v1866_v16 }
 0x12b   :  { %v768_v48 = vadd.f32 %v767_v18, %v1854_v63  ;;  %v900_v42 = vadd.f32 %v899_v27, %v837_v17  ;;  %v1992_v27 = vpop.f32.mrf.mxu1 }
 0x12c   :  { %2721 = vst [vmem:[#allocation16_spill] sm:$0xff] %v1992_v27 }
 0x12d   :  { %v901_v41 = vadd.f32 %v900_v42, %v838_v39  ;;  %v769_v20 = vadd.f32 %v768_v48, %v1878_v32  ;;  %v842_v39 = vmul.f32 %v1902_v0, %v1902_v0 }
 0x12f   :  { %v770_v58 = vadd.f32 %v1842_v24, %v769_v20  ;;  %v902_v3 = vadd.f32 %v901_v41, %v839_v53  ;;  %v843_v20 = vmul.f32 %v1926_v47, %v1926_v47  ;;  %v2000_v41 = vpop.f32.mrf.mxu1  ;;  %v844_v53 = vmul.f32 %v1890_v46, %v1890_v46 }
 0x130   :  { %2722 = vst [vmem:[#allocation17_spill] sm:$0xff] %v2000_v41 }
 0x131   :  { %v903_v18 = vadd.f32 %v902_v3, %v840_v28  ;;  %v771_v17 = vadd.f32 %v1866_v16, %v770_v58  ;;  %v845_v3 = vmul.f32 %v1914_v23, %v1914_v23 }
 0x133   :  { %v772_v48 = vadd.f32 %v771_v17, %v1902_v0  ;;  %v904_v42 = vadd.f32 %v903_v18, %v841_v12  ;;  %v2008_v18 = vpop.f32.mrf.mxu1 }
 0x134   :  { %2723 = vst [vmem:[#allocation18_spill] sm:$0xff] %v2008_v18 }
 0x135   :  { %v905_v32 = vadd.f32 %v904_v42, %v842_v39  ;;  %v773_v63 = vadd.f32 %v772_v48, %v1926_v47  ;;  %v846_v39 = vmul.f32 %v1944_v36, %v1944_v36 }
 0x137   :  { %v774_v28 = vadd.f32 %v1890_v46, %v773_v63  ;;  %v906_v58 = vadd.f32 %v905_v32, %v843_v20  ;;  %v847_v63 = vmul.f32 %v1960_v33, %v1960_v33  ;;  %v2016_v32 = vpop.f32.mrf.mxu1  ;;  %v848_v20 = vmul.f32 %v1936_v5, %v1936_v5 }
 0x138   :  { %2724 = vst [vmem:[#allocation19_spill] sm:$0xff] %v2016_v32 }
 0x139   :  { %v907_v17 = vadd.f32 %v906_v58, %v844_v53  ;;  %v775_v12 = vadd.f32 %v1914_v23, %v774_v28  ;;  %v849_v58 = vmul.f32 %v1952_v1, %v1952_v1 }
 0x13b   :  { %v776_v48 = vadd.f32 %v775_v12, %v1944_v36  ;;  %v908_v42 = vadd.f32 %v907_v17, %v845_v3  ;;  %v2024_v17 = vpop.f32.mrf.mxu1 }
 0x13c   :  { %2725 = vst [vmem:[#allocation20_spill] sm:$0xff] %v2024_v17 }
 0x13d   :  { %v909_v47 = vadd.f32 %v908_v42, %v846_v39  ;;  %v777_v0 = vadd.f32 %v776_v48, %v1960_v33  ;;  %v850_v39 = vmul.f32 %v1976_v26, %v1976_v26 }
 0x13f   :  { %v778_v53 = vadd.f32 %v1936_v5, %v777_v0  ;;  %v910_v28 = vadd.f32 %v909_v47, %v847_v63  ;;  %v851_v0 = vmul.f32 %v1992_v27, %v1992_v27  ;;  %v2032_v47 = vpop.f32.mrf.mxu1  ;;  %v852_v63 = vmul.f32 %v1968_v15, %v1968_v15 }
 0x141   :  { %v911_v12 = vadd.f32 %v910_v28, %v848_v20  ;;  %v779_v3 = vadd.f32 %v1952_v1, %v778_v53  ;;  %v853_v28 = vmul.f32 %v1984_v62, %v1984_v62 }
 0x143   :  { %v780_v48 = vadd.f32 %v779_v3, %v1976_v26  ;;  %v912_v42 = vadd.f32 %v911_v12, %v849_v58  ;;  %v2040_v12 = vpop.f32.mrf.mxu1 }
 0x144   :  { %2726 = vst [vmem:[#allocation21_spill] sm:$0xff] %v2040_v12 }
 0x145   :  { %v913_v33 = vadd.f32 %v912_v42, %v850_v39  ;;  %v781_v36 = vadd.f32 %v780_v48, %v1992_v27  ;;  %v854_v39 = vmul.f32 %v2008_v18, %v2008_v18 }
 0x147   :  { %v782_v20 = vadd.f32 %v1968_v15, %v781_v36  ;;  %v914_v53 = vadd.f32 %v913_v33, %v851_v0  ;;  %v855_v36 = vmul.f32 %v2024_v17, %v2024_v17  ;;  %v2048_v33 = vpop.f32.mrf.mxu1  ;;  %v856_v0 = vmul.f32 %v2000_v41, %v2000_v41 }
 0x149   :  { %v915_v3 = vadd.f32 %v914_v53, %v852_v63  ;;  %v783_v58 = vadd.f32 %v1984_v62, %v782_v20  ;;  %v857_v53 = vmul.f32 %v2016_v32, %v2016_v32 }
 0x14b   :  { %v784_v48 = vadd.f32 %v783_v58, %v2008_v18  ;;  %v916_v42 = vadd.f32 %v915_v3, %v853_v28  ;;  %v2056_v3 = vpop.f32.mrf.mxu1 }
 0x14c   :  { %2727 = vst [vmem:[#allocation22_spill] sm:$0xff] %v2056_v3 }
 0x14d   :  { %v917_v27 = vadd.f32 %v916_v42, %v854_v39  ;;  %v785_v26 = vadd.f32 %v784_v48, %v2024_v17  ;;  %v858_v39 = vmul.f32 %v2040_v12, %v2040_v12 }
 0x14f   :  { %v786_v63 = vadd.f32 %v2000_v41, %v785_v26  ;;  %v918_v20 = vadd.f32 %v917_v27, %v855_v36  ;;  %v859_v26 = vmul.f32 %v2056_v3, %v2056_v3  ;;  %v860_v27 = vmul.f32 %v2032_v47, %v2032_v47 }
 0x151   :  { %v919_v58 = vadd.f32 %v918_v20, %v856_v0  ;;  %v787_v28 = vadd.f32 %v2016_v32, %v786_v63  ;;  %v861_v63 = vmul.f32 %v2048_v33, %v2048_v33 }
 0x153   :  { %v788_v48 = vadd.f32 %v787_v28, %v2040_v12  ;;  %v920_v42 = vadd.f32 %v919_v58, %v857_v53 }
 0x155   :  { %v921_v17 = vadd.f32 %v920_v42, %v858_v39  ;;  %v789_v18 = vadd.f32 %v788_v48, %v2056_v3 }
 0x157   :  { %v790_v36 = vadd.f32 %v2032_v47, %v789_v18  ;;  %v922_v0 = vadd.f32 %v921_v17, %v859_v26 }
 0x159   :  { %v791_v20 = vadd.f32 %v2048_v33, %v790_v36  ;;  %v923_v28 = vadd.f32 %v922_v0, %v860_v27 }
 0x15b   :  { %v792_v12 = vrot.slane %v791_v20, 4  ;;  %v924_v53 = vadd.f32 %v923_v28, %v861_v63 }
 0x15d   :  { %v793_v58 = vadd.f32 %v792_v12, %v791_v20  ;;  %v925_v39 = vrot.slane %v924_v53, 4 }
 0x15f   :  { %v794_v48 = vrot.slane %v793_v58, 2  ;;  %v926_v42 = vadd.f32 %v925_v39, %v924_v53 }
 0x161   :  { %v795_v32 = vadd.f32 %v794_v48, %v793_v58  ;;  %v927_v3 = vrot.slane %v926_v42, 2  ;;  %v964_v48 = vld [vmem:[%s2683_s2] sm:$0x1] }
 0x163   :  { %v796_v41 = vrot.slane %v795_v32, 1  ;;  %v928_v62 = vadd.f32 %v927_v3, %v926_v42 }
 0x165   :  { %v797_v15 = vadd.f32 %v796_v41, %v795_v32  ;;  %v929_v1 = vrot.slane %v928_v62, 1 }
 0x167   :  { %940 = vrot.lane.b32.xlu1 %v797_v15, %s1406_s0  ;;  %932 = vrot.lane.b32.xlu0 %v797_v15, %s1407_s10  ;;  %v930_v18 = vadd.f32 %v929_v1, %v928_v62 }
 0x16b   :  { %945 = vrot.lane.b32.xlu1 %v930_v18, %s1407_s10  ;;  %936 = vrot.lane.b32.xlu0 %v797_v15, %s1408_s11 }
 0x16f   :  { %953 = vrot.lane.b32.xlu1 %v930_v18, %s1406_s0  ;;  %949 = vrot.lane.b32.xlu0 %v930_v18, %s1408_s11 }
 0x1d9   :  { %v941_v17 = vpop.permute.xlu1 %940  ;;  %v933_v12 = vpop.permute.xlu0 %932 }
 0x1da   :  { %v935_v41 = vadd.f32 %v933_v12, %v797_v15 }
 0x1dd   :  { %v946_v32 = vpop.permute.xlu1 %945  ;;  %v937_v3 = vpop.permute.xlu0 %936 }
 0x1de   :  { %v939_v26 = vadd.f32 %v937_v3, %v935_v41  ;;  %v948_v27 = vadd.f32 %v946_v32, %v930_v18  ;;  %v965_v18 = vld [vmem:[%s2683_s2 + $0x1] sm:$0x1]  ;;  %v998_v41 = vlaneseq }
 0x1e0   :  { %v943_v36 = vadd.f32 %v941_v17, %v939_v26  ;;  %v2088_v32 = vshrl.u32 %v998_v41, 7 }
 0x1e1   :  { %v950_v0 = vpop.permute.xlu0 %949  ;;  %v954_v62 = vpop.permute.xlu1 %953 }
 0x1e2   :  { %v958_v63 = vmul.f32 0.00048828125, %v943_v36  ;;  %v952_v1 = vadd.f32 %v950_v0, %v948_v27  ;;  %v2706_v36 = vsub.s32 0, %v2088_v32 }
 0x1e4   :  { %v956_v20 = vadd.f32 %v954_v62, %v952_v1  ;;  %v960_v28 = vmul.f32 %v958_v63, %v958_v63 }
 0x1e6   :  { %v959_v53 = vmul.f32 0.00048828125, %v956_v20 }
 0x1e8   :  { %v961_v58 = vsub.f32 %v959_v53, %v960_v28 }
 0x1ea   :  { %v962_v39 = vadd.f32 1e-05, %v961_v58 }
 0x1ec   :  { %1403 = vrsqrt.f32 %v962_v39 }
 0x1f9   :  { %v1404_v15 = vpop.eup %1403 }
 0x1fa   :  { %v966_v42 = vmul.f32 %v1404_v15, %v964_v48 }
 0x1fc   :  { %973 = vrot.lane.b32.xlu1 %v966_v42, %s1408_s11  ;;  %970 = vrot.lane.b32.xlu0 %v966_v42, %s1406_s0  ;;  %v967_v17 = vmul.f32 %v966_v42, %v958_v63 }
 0x1fe   :  { %v968_v12 = vsub.f32 %v965_v18, %v967_v17  ;;  %v2729_v18 = vld [vmem:[#allocation3_spill] sm:$0xff]  ;;  %v2730_v17 = vld [vmem:[#allocation4_spill] sm:$0xff] }
 0x200   :  { %976 = vrot.lane.b32.xlu0 %v966_v42, %s1407_s10  ;;  %986 = vrot.lane.b32.xlu1 %v968_v12, %s1406_s0 }
 0x204   :  { %989 = vrot.lane.b32.xlu0 %v968_v12, %s1408_s11  ;;  %992 = vrot.lane.b32.xlu1 %v968_v12, %s1407_s10 }
 0x26e   :  { %v971_v3 = vpop.permute.xlu0 %970  ;;  %v974_v26 = vpop.permute.xlu1 %973 }
 0x26f   :  { %v980_v27 = vsel %vm979_vm2, %v966_v42, %v971_v3  ;;  %v2728_v42 = vld [vmem:[#allocation2_spill] sm:$0xff] }
 0x270   :  { %v982_v0 = vsel %vm981_vm3, %v980_v27, %v974_v26  ;;  %v2732_v26 = vld [vmem:[#allocation6_spill] sm:$0xff]  ;;  %v2733_v27 = vld [vmem:[#allocation7_spill] sm:$0xff] }
 0x272   :  { %v977_v63 = vpop.permute.xlu0 %976  ;;  %v987_v20 = vpop.permute.xlu1 %986 }
 0x273   :  { %v984_v1 = vsel %vm983_vm4, %v982_v0, %v977_v63  ;;  %v995_v39 = vsel %vm979_vm2, %v968_v12, %v987_v20  ;;  %v2731_v12 = vld [vmem:[#allocation5_spill] sm:$0xff]  ;;  %v2734_v20 = vld [vmem:[#allocation8_spill] sm:$0xff] }
 0x274   :  { %v2096_v62 = vrot.slane %v984_v1, %v2706_v36 }
 0x276   :  { %v2100_v28 = vmul.f32 %v2096_v62, %v1752_v50  ;;  %v2104_v53 = vmul.f32 %v2096_v62, %v1760_v54  ;;  %v2108_v58 = vmul.f32 %v1750_v6, %v2096_v62  ;;  %v2113_v48 = vmul.f32 %v1756_v52, %v2096_v62  ;;  %v990_v1 = vpop.permute.xlu0 %989 }
 0x277   :  { %v2117_v15 = vmul.f32 %v2096_v62, %v1775_v57  ;;  %v2121_v50 = vmul.f32 %v2096_v62, %v1787_v2  ;;  %v2125_v54 = vmul.f32 %v1768_v7, %v2096_v62  ;;  %v2129_v6 = vmul.f32 %v1780_v61, %v2096_v62 }
 0x278   :  { %v2133_v52 = vmul.f32 %v2096_v62, %v1799_v14  ;;  %v2137_v57 = vmul.f32 %v2096_v62, %v1811_v25  ;;  %v2141_v2 = vmul.f32 %v1792_v9, %v2096_v62  ;;  %v2145_v7 = vmul.f32 %v1804_v19, %v2096_v62 }
 0x279   :  { %v2149_v61 = vmul.f32 %v2096_v62, %v1823_v35  ;;  %v2153_v14 = vmul.f32 %v2096_v62, %v1835_v45  ;;  %v2157_v25 = vmul.f32 %v1816_v30, %v2096_v62  ;;  %v2161_v9 = vmul.f32 %v1828_v40, %v2096_v62 }
 0x27a   :  { %v2165_v19 = vmul.f32 %v2096_v62, %v1847_v55  ;;  %v2169_v35 = vmul.f32 %v2096_v62, %v1859_v4  ;;  %v2173_v45 = vmul.f32 %v1840_v49, %v2096_v62  ;;  %v2177_v30 = vmul.f32 %v1852_v60, %v2096_v62 }
 0x27b   :  { %v2181_v40 = vmul.f32 %v2096_v62, %v1871_v22  ;;  %v2185_v55 = vmul.f32 %v2096_v62, %v1883_v37  ;;  %v2189_v4 = vmul.f32 %v1864_v13, %v2096_v62  ;;  %v2193_v49 = vmul.f32 %v1876_v29, %v2096_v62 }
 0x27c   :  { %v2197_v60 = vmul.f32 %v2096_v62, %v1895_v38  ;;  %v2201_v22 = vmul.f32 %v2096_v62, %v1907_v11  ;;  %v2205_v37 = vmul.f32 %v1888_v44, %v2096_v62  ;;  %v2209_v13 = vmul.f32 %v1900_v59, %v2096_v62 }
 0x27d   :  { %v2213_v29 = vmul.f32 %v2096_v62, %v1919_v34  ;;  %v2217_v38 = vmul.f32 %v2096_v62, %v1931_v56  ;;  %v2221_v11 = vmul.f32 %v1912_v21, %v2096_v62  ;;  %v2225_v44 = vmul.f32 %v1924_v43, %v2096_v62 }
 0x27e   :  { %v2229_v59 = vmul.f32 %v2096_v62, %v2728_v42  ;;  %v2233_v34 = vmul.f32 %v2096_v62, %v2729_v18  ;;  %v2237_v56 = vmul.f32 %v1754_v51, %v2096_v62  ;;  %v2241_v21 = vmul.f32 %v1770_v8, %v2096_v62  ;;  %v2735_v42 = vld [vmem:[#allocation9_spill] sm:$0xff] }
 0x27f   :  { %v2245_v43 = vmul.f32 %v2096_v62, %v2730_v17  ;;  %v2249_v41 = vmul.f32 %v2096_v62, %v2731_v12  ;;  %v2253_v3 = vmul.f32 %v1794_v10, %v2096_v62  ;;  %v2257_v51 = vmul.f32 %v1818_v31, %v2096_v62  ;;  %v993_v12 = vpop.permute.xlu1 %992 }
 0x280   :  { %v2261_v8 = vmul.f32 %v2096_v62, %v2732_v26  ;;  %v2265_v0 = vmul.f32 %v2096_v62, %v2733_v27  ;;  %v2269_v63 = vmul.f32 %v1842_v24, %v2096_v62  ;;  %v2273_v10 = vmul.f32 %v1866_v16, %v2096_v62  ;;  %v2738_v26 = vld [vmem:[#allocation10_spill] sm:$0xff]  ;;  %v2740_v27 = vld [vmem:[#allocation12_spill] sm:$0xff] }
 0x281   :  { %v2277_v31 = vmul.f32 %v2096_v62, %v2734_v20  ;;  %v2281_v18 = vmul.f32 %v2096_v62, %v2735_v42  ;;  %v2285_v17 = vmul.f32 %v1890_v46, %v2096_v62  ;;  %v2289_v24 = vmul.f32 %v1914_v23, %v2096_v62  ;;  %v2743_v46 = vld [vmem:[#allocation11_spill] sm:$0xff] }
 0x282   :  { %v2293_v16 = vmul.f32 %v2096_v62, %v2738_v26  ;;  %v2297_v20 = vmul.f32 %v2096_v62, %v2740_v27  ;;  %v2301_v42 = vmul.f32 %v1936_v5, %v2096_v62  ;;  %v2305_v36 = vmul.f32 %v2743_v46, %v2096_v62  ;;  %v2748_v27 = vld [vmem:[#allocation13_spill] sm:$0xff]  ;;  %v2750_v5 = vld [vmem:[#allocation15_spill] sm:$0xff]  ;;  %v2752_v46 = vld [vmem:[#allocation18_spill] sm:$0xff] }
 0x283   :  { %2736 = vst [vmem:[#allocation2_spill] sm:$0xff] %v2285_v17  ;;  %2737 = vst [vmem:[#allocation3_spill] sm:$0xff] %v2289_v24  ;;  %v2745_v17 = vld [vmem:[#allocation14_spill] sm:$0xff]  ;;  %v2747_v24 = vld [vmem:[#allocation16_spill] sm:$0xff] }
 0x284   :  { %2739 = vst [vmem:[#allocation4_spill] sm:$0xff] %v2293_v16  ;;  %2741 = vst [vmem:[#allocation5_spill] sm:$0xff] %v2297_v20  ;;  %v2309_v23 = vmul.f32 %v2096_v62, %v2745_v17  ;;  %v2313_v26 = vmul.f32 %v2096_v62, %v2747_v24  ;;  %v996_v16 = vsel %vm981_vm3, %v995_v39, %v990_v1  ;;  %v2755_v39 = vld [vmem:[#allocation17_spill] sm:$0xff] }
 0x285   :  { %2742 = vst [vmem:[#allocation6_spill] sm:$0xff] %v2301_v42  ;;  %2744 = vst [vmem:[#allocation7_spill] sm:$0xff] %v2305_v36  ;;  %v2318_v20 = vmul.f32 %v2748_v27, %v2096_v62  ;;  %v2322_v42 = vmul.f32 %v2750_v5, %v2096_v62  ;;  %v2326_v36 = vmul.f32 %v2096_v62, %v2752_v46  ;;  %v2756_v27 = vld [vmem:[#allocation19_spill] sm:$0xff]  ;;  %v2757_v5 = vsub.s32 0, %v2088_v32  ;;  %v2758_v46 = vld [vmem:[#allocation21_spill] sm:$0xff] }
 0x286   :  { %2746 = vst [vmem:[#allocation8_spill] sm:$0xff] %v2309_v23  ;;  %v997_v17 = vsel %vm983_vm4, %v996_v16, %v993_v12  ;;  %v2754_v23 = vld [vmem:[#allocation20_spill] sm:$0xff]  ;;  %v2335_v1 = vmul.f32 %v2755_v39, %v2096_v62  ;;  %v2759_v12 = vld [vmem:[#allocation22_spill] sm:$0xff]  ;;  %v2359_v39 = vmul.f32 %v2048_v33, %v2096_v62 }
 0x287   :  { %2749 = vst [vmem:[#allocation9_spill] sm:$0xff] %v2318_v20  ;;  %2751 = vst [vmem:[#allocation10_spill] sm:$0xff] %v2322_v42  ;;  %v2331_v24 = vmul.f32 %v2096_v62, %v2754_v23  ;;  %v2339_v20 = vmul.f32 %v2756_v27, %v2096_v62  ;;  %v2343_v42 = vrot.slane %v997_v17, %v2757_v5 }
 0x288   :  { %2753 = vst [vmem:[#allocation12_spill] sm:$0xff] %v2326_v36  ;;  %v2347_v36 = vmul.f32 %v2096_v62, %v2758_v46  ;;  %v2351_v16 = vmul.f32 %v2096_v62, %v2759_v12  ;;  %v2355_v23 = vmul.f32 %v2032_v47, %v2096_v62 }
 0x289   :  { %v1070_v32 = vadd.f32 %v2343_v42, %v2100_v28  ;;  %v1071_v17 = vadd.f32 %v2343_v42, %v2104_v53  ;;  %v1072_v27 = vadd.f32 %v2343_v42, %v2108_v58  ;;  %v1073_v5 = vadd.f32 %v2343_v42, %v2113_v48 }
 0x28a   :  { %v1074_v47 = vadd.f32 %v2343_v42, %v2117_v15  ;;  %v1075_v46 = vadd.f32 %v2343_v42, %v2121_v50  ;;  %v1076_v33 = vadd.f32 %v2343_v42, %v2125_v54  ;;  %v1077_v62 = vadd.f32 %v2343_v42, %v2129_v6 }
 0x28b   :  { %v1078_v28 = vadd.f32 %v2343_v42, %v2133_v52  ;;  %v1079_v53 = vadd.f32 %v2343_v42, %v2137_v57  ;;  %v1080_v58 = vadd.f32 %v2343_v42, %v2141_v2  ;;  %v1081_v48 = vadd.f32 %v2343_v42, %v2145_v7  ;;  %1134 = vst [vmem:[%s2684_s3] sm:$0xff] %v1070_v32 }
 0x28c   :  { %1135 = vst [vmem:[%s2684_s3 + $0x8] sm:$0xff] %v1071_v17  ;;  %1136 = vst [vmem:[%s2684_s3 + $0x10] sm:$0xff] %v1072_v27  ;;  %v1082_v15 = vadd.f32 %v2343_v42, %v2149_v61  ;;  %v1083_v50 = vadd.f32 %v2343_v42, %v2153_v14  ;;  %v1084_v54 = vadd.f32 %v2343_v42, %v2157_v25  ;;  %v2764_v12 = vld [vmem:[#allocation6_spill] sm:$0xff]  ;;  %v2765_v17 = vld [vmem:[#allocation7_spill] sm:$0xff] }
 0x28d   :  { %1137 = vst [vmem:[%s2684_s3 + $0x18] sm:$0xff] %v1073_v5  ;;  %v1085_v6 = vadd.f32 %v2343_v42, %v2161_v9  ;;  %1138 = vst [vmem:[%s2684_s3 + $0x20] sm:$0xff] %v1074_v47  ;;  %v1086_v52 = vadd.f32 %v2343_v42, %v2165_v19  ;;  %v1087_v57 = vadd.f32 %v2343_v42, %v2169_v35  ;;  %v2766_v5 = vld [vmem:[#allocation8_spill] sm:$0xff] }
 0x28e   :  { %1139 = vst [vmem:[%s2684_s3 + $0x28] sm:$0xff] %v1075_v46  ;;  %1140 = vst [vmem:[%s2684_s3 + $0x30] sm:$0xff] %v1076_v33  ;;  %v1088_v2 = vadd.f32 %v2343_v42, %v2173_v45  ;;  %v1089_v7 = vadd.f32 %v2343_v42, %v2177_v30  ;;  %v1090_v61 = vadd.f32 %v2343_v42, %v2181_v40  ;;  %v2767_v33 = vld [vmem:[#allocation9_spill] sm:$0xff] }
 0x28f   :  { %1141 = vst [vmem:[%s2684_s3 + $0x38] sm:$0xff] %v1077_v62  ;;  %1142 = vst [vmem:[%s2684_s3 + $0x40] sm:$0xff] %v1078_v28  ;;  %v1091_v14 = vadd.f32 %v2343_v42, %v2185_v55  ;;  %v1092_v25 = vadd.f32 %v2343_v42, %v2189_v4  ;;  %v1093_v9 = vadd.f32 %v2343_v42, %v2193_v49  ;;  %v2768_v28 = vld [vmem:[#allocation10_spill] sm:$0xff] }
 0x290   :  { %1143 = vst [vmem:[%s2684_s3 + $0x48] sm:$0xff] %v1079_v53  ;;  %1144 = vst [vmem:[%s2684_s3 + $0x50] sm:$0xff] %v1080_v58  ;;  %v1094_v19 = vadd.f32 %v2343_v42, %v2197_v60  ;;  %v1095_v35 = vadd.f32 %v2343_v42, %v2201_v22  ;;  %v1096_v45 = vadd.f32 %v2343_v42, %v2205_v37 }
 0x291   :  { %1145 = vst [vmem:[%s2684_s3 + $0x58] sm:$0xff] %v1081_v48  ;;  %1146 = vst [vmem:[%s2684_s3 + $0x60] sm:$0xff] %v1082_v15  ;;  %v1097_v30 = vadd.f32 %v2343_v42, %v2209_v13  ;;  %v1098_v40 = vadd.f32 %v2343_v42, %v2213_v29  ;;  %v1099_v55 = vadd.f32 %v2343_v42, %v2217_v38 }
 0x292   :  { %1147 = vst [vmem:[%s2684_s3 + $0x68] sm:$0xff] %v1083_v50  ;;  %1148 = vst [vmem:[%s2684_s3 + $0x70] sm:$0xff] %v1084_v54  ;;  %v1100_v4 = vadd.f32 %v2343_v42, %v2221_v11  ;;  %v1101_v49 = vadd.f32 %v2343_v42, %v2225_v44  ;;  %v1102_v60 = vadd.f32 %v2343_v42, %v2229_v59 }
 0x293   :  { %1149 = vst [vmem:[%s2684_s3 + $0x78] sm:$0xff] %v1085_v6  ;;  %1150 = vst [vmem:[%s2684_s3 + $0x80] sm:$0xff] %v1086_v52  ;;  %v1103_v22 = vadd.f32 %v2343_v42, %v2233_v34  ;;  %v1104_v37 = vadd.f32 %v2343_v42, %v2237_v56  ;;  %v1105_v13 = vadd.f32 %v2343_v42, %v2241_v21 }
 0x294   :  { %1151 = vst [vmem:[%s2684_s3 + $0x88] sm:$0xff] %v1087_v57  ;;  %1152 = vst [vmem:[%s2684_s3 + $0x90] sm:$0xff] %v1088_v2  ;;  %v1106_v29 = vadd.f32 %v2343_v42, %v2245_v43  ;;  %v1107_v38 = vadd.f32 %v2343_v42, %v2249_v41  ;;  %v1108_v11 = vadd.f32 %v2343_v42, %v2253_v3  ;;  %v2760_v3 = vld [vmem:[#allocation2_spill] sm:$0xff] }
 0x295   :  { %1153 = vst [vmem:[%s2684_s3 + $0x98] sm:$0xff] %v1089_v7  ;;  %1154 = vst [vmem:[%s2684_s3 + $0xa0] sm:$0xff] %v1090_v61  ;;  %v1109_v44 = vadd.f32 %v2343_v42, %v2257_v51  ;;  %v1110_v59 = vadd.f32 %v2343_v42, %v2261_v8  ;;  %v1111_v34 = vadd.f32 %v2343_v42, %v2265_v0  ;;  %v2761_v8 = vld [vmem:[#allocation3_spill] sm:$0xff] }
 0x296   :  { %1155 = vst [vmem:[%s2684_s3 + $0xa8] sm:$0xff] %v1091_v14  ;;  %1156 = vst [vmem:[%s2684_s3 + $0xb0] sm:$0xff] %v1092_v25  ;;  %v1112_v56 = vadd.f32 %v2343_v42, %v2269_v63  ;;  %v1113_v21 = vadd.f32 %v2343_v42, %v2273_v10  ;;  %v1114_v43 = vadd.f32 %v2343_v42, %v2277_v31  ;;  %v2762_v63 = vld [vmem:[#allocation4_spill] sm:$0xff]  ;;  %v2763_v31 = vld [vmem:[#allocation5_spill] sm:$0xff] }
 0x297   :  { %1157 = vst [vmem:[%s2684_s3 + $0xb8] sm:$0xff] %v1093_v9  ;;  %1158 = vst [vmem:[%s2684_s3 + $0xc0] sm:$0xff] %v1094_v19  ;;  %v1115_v41 = vadd.f32 %v2343_v42, %v2281_v18  ;;  %v1116_v51 = vadd.f32 %v2343_v42, %v2760_v3  ;;  %v1117_v0 = vadd.f32 %v2343_v42, %v2761_v8 }
 0x298   :  { %1159 = vst [vmem:[%s2684_s3 + $0xc8] sm:$0xff] %v1095_v35  ;;  %1160 = vst [vmem:[%s2684_s3 + $0xd0] sm:$0xff] %v1096_v45  ;;  %v1118_v10 = vadd.f32 %v2343_v42, %v2762_v63  ;;  %v1119_v18 = vadd.f32 %v2343_v42, %v2763_v31  ;;  %v1120_v32 = vadd.f32 %v2343_v42, %v2764_v12 }
 0x299   :  { %1161 = vst [vmem:[%s2684_s3 + $0xd8] sm:$0xff] %v1097_v30  ;;  %1162 = vst [vmem:[%s2684_s3 + $0xe0] sm:$0xff] %v1098_v40  ;;  %v1121_v27 = vadd.f32 %v2343_v42, %v2765_v17  ;;  %v1122_v47 = vadd.f32 %v2343_v42, %v2766_v5  ;;  %v1123_v46 = vadd.f32 %v2343_v42, %v2313_v26  ;;  %v2769_v26 = vld [vmem:[#allocation12_spill] sm:$0xff] }
 0x29a   :  { %1163 = vst [vmem:[%s2684_s3 + $0xe8] sm:$0xff] %v1099_v55  ;;  %1164 = vst [vmem:[%s2684_s3 + $0xf0] sm:$0xff] %v1100_v4  ;;  %v1124_v62 = vadd.f32 %v2343_v42, %v2767_v33  ;;  %v1125_v53 = vadd.f32 %v2343_v42, %v2768_v28  ;;  %v1126_v58 = vadd.f32 %v2343_v42, %v2769_v26 }
 0x29b   :  { %1165 = vst [vmem:[%s2684_s3 + $0xf8] sm:$0xff] %v1101_v49  ;;  %1166 = vst [vmem:[%s2684_s3 + $0x100] sm:$0xff] %v1102_v60  ;;  %v1127_v48 = vadd.f32 %v2343_v42, %v2331_v24  ;;  %v1128_v15 = vadd.f32 %v2343_v42, %v2335_v1  ;;  %v1129_v50 = vadd.f32 %v2343_v42, %v2339_v20 }
 0x29c   :  { %1167 = vst [vmem:[%s2684_s3 + $0x108] sm:$0xff] %v1103_v22  ;;  %1168 = vst [vmem:[%s2684_s3 + $0x110] sm:$0xff] %v1104_v37  ;;  %v1130_v24 = vadd.f32 %v2343_v42, %v2347_v36  ;;  %v1131_v20 = vadd.f32 %v2343_v42, %v2351_v16  ;;  %v1132_v1 = vadd.f32 %v2343_v42, %v2355_v23 }
 0x29d   :  { %1169 = vst [vmem:[%s2684_s3 + $0x118] sm:$0xff] %v1105_v13  ;;  %1170 = vst [vmem:[%s2684_s3 + $0x120] sm:$0xff] %v1106_v29  ;;  %v1133_v54 = vadd.f32 %v2343_v42, %v2359_v39 }
 0x29e   :  { %1171 = vst [vmem:[%s2684_s3 + $0x128] sm:$0xff] %v1107_v38  ;;  %1172 = vst [vmem:[%s2684_s3 + $0x130] sm:$0xff] %v1108_v11 }
 0x29f   :  { %1173 = vst [vmem:[%s2684_s3 + $0x138] sm:$0xff] %v1109_v44  ;;  %1174 = vst [vmem:[%s2684_s3 + $0x140] sm:$0xff] %v1110_v59 }
 0x2a0   :  { %1175 = vst [vmem:[%s2684_s3 + $0x148] sm:$0xff] %v1111_v34  ;;  %1176 = vst [vmem:[%s2684_s3 + $0x150] sm:$0xff] %v1112_v56 }
 0x2a1   :  { %1177 = vst [vmem:[%s2684_s3 + $0x158] sm:$0xff] %v1113_v21  ;;  %1178 = vst [vmem:[%s2684_s3 + $0x160] sm:$0xff] %v1114_v43 }
 0x2a2   :  { %1179 = vst [vmem:[%s2684_s3 + $0x168] sm:$0xff] %v1115_v41  ;;  %1180 = vst [vmem:[%s2684_s3 + $0x170] sm:$0xff] %v1116_v51 }
 0x2a3   :  { %1181 = vst [vmem:[%s2684_s3 + $0x178] sm:$0xff] %v1117_v0  ;;  %1182 = vst [vmem:[%s2684_s3 + $0x180] sm:$0xff] %v1118_v10 }
 0x2a4   :  { %1183 = vst [vmem:[%s2684_s3 + $0x188] sm:$0xff] %v1119_v18  ;;  %1184 = vst [vmem:[%s2684_s3 + $0x190] sm:$0xff] %v1120_v32 }
 0x2a5   :  { %1185 = vst [vmem:[%s2684_s3 + $0x198] sm:$0xff] %v1121_v27  ;;  %1186 = vst [vmem:[%s2684_s3 + $0x1a0] sm:$0xff] %v1122_v47 }
 0x2a6   :  { %1187 = vst [vmem:[%s2684_s3 + $0x1a8] sm:$0xff] %v1123_v46  ;;  %1188 = vst [vmem:[%s2684_s3 + $0x1b0] sm:$0xff] %v1124_v62 }
 0x2a7   :  { %1189 = vst [vmem:[%s2684_s3 + $0x1b8] sm:$0xff] %v1125_v53  ;;  %1190 = vst [vmem:[%s2684_s3 + $0x1c0] sm:$0xff] %v1126_v58 }
 0x2a8   :  { %1191 = vst [vmem:[%s2684_s3 + $0x1c8] sm:$0xff] %v1127_v48  ;;  %1192 = vst [vmem:[%s2684_s3 + $0x1d0] sm:$0xff] %v1128_v15 }
 0x2a9   :  { %1193 = vst [vmem:[%s2684_s3 + $0x1d8] sm:$0xff] %v1129_v50  ;;  %1194 = vst [vmem:[%s2684_s3 + $0x1e0] sm:$0xff] %v1130_v24 }
 0x2aa   :  { %1195 = vst [vmem:[%s2684_s3 + $0x1e8] sm:$0xff] %v1131_v20  ;;  %1196 = vst [vmem:[%s2684_s3 + $0x1f0] sm:$0xff] %v1132_v1 }
 0x2ab   :  { %1197 = vst [vmem:[%s2684_s3 + $0x1f8] sm:$0xff] %v1133_v54 }

</bundles_post_ra>
